<compile_context>
chip_gen: v5e
topology: v5e:2x2
jax: 0.10.0
libtpu: 0.0.40
codegen_flags: <defaults>
</compile_context>

<pallas_src>
import jax
import jax.numpy as jnp
from jax.experimental import pallas as pl
from jax.experimental.pallas import tpu as pltpu

MAT_DIFF_LOSS_SCALE = 0.001


def _choose_block_b(B, K):
    """Pick a batch tile so the double-buffered trans block stays VMEM-friendly."""
    lane_k = ((K + 127) // 128) * 128            # lane padding of the last dim
    per_sample_bytes = K * lane_k * 4            # f32 trans tile per sample
    budget = 8 * 1024 * 1024                     # per buffer; x2 double-buffer << 32 MiB scoped VMEM (safe on v7x)
    bt = max(1, budget // per_sample_bytes)
    bt = min(B, bt)
    if bt >= 8:
        bt = (bt // 8) * 8                       # keep sublane-aligned tiles
    return bt


def _make_kernel(B, C, K, block_b, needs_mask, use_bf16_matmul):
    inv_b = 1.0 / float(B)                       # compile-time constants
    reg_scale = MAT_DIFF_LOSS_SCALE / float(B)

    def kernel(pred_ref, target_ref, trans_ref, out_ref):
        pred = pred_ref[...]                     # (BT, C) f32
        tgt = target_ref[...]                    # (BT, 1) i32
        trans = trans_ref[...]                   # (BT, K, K) f32

        # --- NLL: pick pred[i, target[i]] via iota-compare (no gather) -----
        cls_idx = jax.lax.broadcasted_iota(jnp.int32, (block_b, C), 1)
        onehot = (cls_idx == tgt).astype(jnp.float32)              # (BT, C)
        picked = jnp.sum(pred * onehot, axis=1, keepdims=True)     # (BT, 1)

        # --- regularizer: ||A A^T - I||_F^2 = sum(G*G) - 2*tr(G) + K -------
        #     with tr(A A^T) == sum(A*A)  (no eye / no diff pass)
        a = trans.astype(jnp.bfloat16) if use_bf16_matmul else trans
        g = jnp.einsum('bij,bkj->bik', a, a,
                       preferred_element_type=jnp.float32)         # (BT, K, K)
        sq_g = jnp.sum(jnp.sum(g * g, axis=2), axis=1, keepdims=True)        # (BT,1)
        tr_g = jnp.sum(jnp.sum(trans * trans, axis=2), axis=1, keepdims=True)  # (BT,1)
        fro2 = sq_g - 2.0 * tr_g + jnp.float32(K)
        fro = jnp.sqrt(jnp.maximum(fro2, 0.0))                     # (BT, 1)

        if needs_mask:
            # mask rows of a partial edge tile (garbage rows contribute 0)
            row = (pl.program_id(0) * block_b
                   + jax.lax.broadcasted_iota(jnp.int32, (block_b, 1), 0))
            valid = row < B
            picked = jnp.where(valid, picked, 0.0)
            fro = jnp.where(valid, fro, 0.0)

        partial = ((-jnp.sum(picked)) * jnp.float32(inv_b)
                   + jnp.sum(fro) * jnp.float32(reg_scale))
        # lane-dense unmasked store; wrapper reads [i, 0, 0]
        out_ref[...] = jnp.full(out_ref.shape, partial, dtype=jnp.float32)

    return kernel


def pointnet_cls_loss(pred, target, trans_feat, *, use_bf16_matmul=False):
    """pred: (B, C) f32 log-probs, target: (B,) int, trans_feat: (B, K, K) f32."""
    B, C = pred.shape
    K = trans_feat.shape[1]
    target2d = target.astype(jnp.int32).reshape(B, 1)

    block_b = _choose_block_b(B, K)
    num_tiles = (B + block_b - 1) // block_b
    needs_mask = (B % block_b) != 0

    kernel = _make_kernel(B, C, K, block_b, needs_mask, use_bf16_matmul)

    cost = pl.CostEstimate(
        flops=2 * B * K * K * K + 4 * B * K * K + 2 * B * C,
        transcendentals=B,                                   # one sqrt per sample
        bytes_accessed=4 * (B * C + B + B * K * K) + 4 * num_tiles * 8 * 128,
    )

    partials = pl.pallas_call(
        kernel,
        out_shape=jax.ShapeDtypeStruct((num_tiles, 8, 128), jnp.float32),
        grid_spec=pl.GridSpec(
            grid=(num_tiles,),
            in_specs=[
                pl.BlockSpec((block_b, C), lambda i: (i, 0)),
                pl.BlockSpec((block_b, 1), lambda i: (i, 0)),
                pl.BlockSpec((block_b, K, K), lambda i: (i, 0, 0)),
            ],
            out_specs=pl.BlockSpec((1, 8, 128), lambda i: (i, 0, 0)),
        ),
        compiler_params=pltpu.CompilerParams(
            dimension_semantics=("parallel",),               # per-tile partials -> megacore-safe
        ),
        cost_estimate=cost,
    )(pred, target2d, trans_feat)

    # final scalar reduction over tiles (scales already folded per-tile)
    return jnp.sum(partials[:, 0, 0])


def _reference_loss(pred, target, trans_feat):
    # Pure-JAX reference for validation.
    nll = -jnp.mean(pred[jnp.arange(pred.shape[0]), target])
    K = trans_feat.shape[1]
    eye = jnp.eye(K, dtype=jnp.float32)
    prod = jnp.einsum('bij,bkj->bik', trans_feat, trans_feat)
    fro = jnp.sqrt(jnp.sum((prod - eye[None]) ** 2, axis=(1, 2)))
    return nll + jnp.mean(fro) * MAT_DIFF_LOSS_SCALE


if __name__ == "__main__":
    B, C, K = 8, 16, 32   # batch, num_classes, feature-transform dim

    key = jax.random.PRNGKey(0)
    k1, k2, k3 = jax.random.split(key, 3)

    # pred = log-softmax of random logits (as PointNet's classifier head emits)
    logits = jax.random.normal(k1, (B, C), dtype=jnp.float32)
    pred = jax.nn.log_softmax(logits, axis=-1)
    target = jax.random.randint(k2, (B,), 0, C, dtype=jnp.int32)
    trans_feat = jax.random.normal(k3, (B, K, K), dtype=jnp.float32) * 0.1

    total = pointnet_cls_loss(pred, target, trans_feat)
    jax.block_until_ready(total)

    ref = _reference_loss(pred, target, trans_feat)
    assert jnp.allclose(total, ref, rtol=1e-5, atol=1e-5), (total, ref)

    print("KERNEL_OK")
</pallas_src>

<mosaic_0001>
module attributes {stable_mosaic.version = 11 : i64} {
  func.func @kernel(%arg0: i32, %arg1: memref<8x16xf32, #tpu.memory_space<vmem>>, %arg2: memref<8x1xi32, #tpu.memory_space<vmem>>, %arg3: memref<8x32x32xf32, #tpu.memory_space<vmem>>, %arg4: memref<1x8x128xf32, #tpu.memory_space<vmem>>) attributes {dimension_semantics = [#tpu.dimension_semantics<parallel>], iteration_bounds = array<i64: 1>, scalar_prefetch = 0 : i64, scratch_operands = 0 : i64, tpu.core_type = #tpu.core_type<tc>, window_params = [{transform_indices = @transform_0, window_bounds = array<i64: 8, 16>}, {transform_indices = @transform_1, window_bounds = array<i64: 8, 1>}, {transform_indices = @transform_2, window_bounds = array<i64: 8, 32, 32>}, {transform_indices = @transform_3, window_bounds = array<i64: 1, 8, 128>}]} {
    %c0 = arith.constant 0 : index
    %c0_0 = arith.constant 0 : index
    %0 = vector.load %arg1[%c0, %c0_0] : memref<8x16xf32, #tpu.memory_space<vmem>>, vector<8x16xf32>
    %c0_1 = arith.constant 0 : index
    %c0_2 = arith.constant 0 : index
    %1 = vector.load %arg2[%c0_1, %c0_2] : memref<8x1xi32, #tpu.memory_space<vmem>>, vector<8x1xi32>
    %c0_3 = arith.constant 0 : index
    %c0_4 = arith.constant 0 : index
    %c0_5 = arith.constant 0 : index
    %2 = vector.load %arg3[%c0_3, %c0_4, %c0_5] : memref<8x32x32xf32, #tpu.memory_space<vmem>>, vector<8x32x32xf32>
    %3 = tpu.iota {dimensions = array<i32: 1>} : vector<8x16xi32>
    %4 = vector.broadcast %1 : vector<8x1xi32> to vector<8x16xi32>
    %5 = arith.cmpi eq, %3, %4 : vector<8x16xi32>
    %6 = arith.extui %5 : vector<8x16xi1> to vector<8x16xi32>
    %7 = arith.sitofp %6 : vector<8x16xi32> to vector<8x16xf32>
    %8 = arith.mulf %0, %7 : vector<8x16xf32>
    %cst = arith.constant dense<0.000000e+00> : vector<8xf32>
    %9 = vector.multi_reduction <add>, %8, %cst [1] : vector<8x16xf32> to vector<8xf32>
    %10 = vector.shape_cast %9 : vector<8xf32> to vector<8x1xf32>
    "tpu.trace_start"() <{level = 10 : i32, message = "bij,bkj->bik"}> : () -> ()
    %cst_6 = arith.constant dense<0.000000e+00> : vector<8x32x32xf32>
    %11 = tpu.matmul %2, %2, %cst_6 {dimension_numbers = #tpu.dot_dimension_numbers<[2], [2], [1], [1], [0, 0, 0, 1, 1, 1], [0], [0]>} : vector<8x32x32xf32>, vector<8x32x32xf32>, vector<8x32x32xf32> -> vector<8x32x32xf32>
    "tpu.trace_stop"() : () -> ()
    %12 = arith.mulf %11, %11 : vector<8x32x32xf32>
    %cst_7 = arith.constant dense<0.000000e+00> : vector<8x32xf32>
    %13 = vector.multi_reduction <add>, %12, %cst_7 [2] : vector<8x32x32xf32> to vector<8x32xf32>
    %cst_8 = arith.constant dense<0.000000e+00> : vector<8xf32>
    %14 = vector.multi_reduction <add>, %13, %cst_8 [1] : vector<8x32xf32> to vector<8xf32>
    %15 = vector.shape_cast %14 : vector<8xf32> to vector<8x1xf32>
    %16 = arith.mulf %2, %2 : vector<8x32x32xf32>
    %cst_9 = arith.constant dense<0.000000e+00> : vector<8x32xf32>
    %17 = vector.multi_reduction <add>, %16, %cst_9 [2] : vector<8x32x32xf32> to vector<8x32xf32>
    %cst_10 = arith.constant dense<0.000000e+00> : vector<8xf32>
    %18 = vector.multi_reduction <add>, %17, %cst_10 [1] : vector<8x32xf32> to vector<8xf32>
    %19 = vector.shape_cast %18 : vector<8xf32> to vector<8x1xf32>
    %cst_11 = arith.constant 2.000000e+00 : f32
    %20 = vector.broadcast %cst_11 : f32 to vector<8x1xf32>
    %21 = arith.mulf %20, %19 : vector<8x1xf32>
    %22 = arith.subf %15, %21 : vector<8x1xf32>
    %cst_12 = arith.constant 3.200000e+01 : f32
    %23 = vector.broadcast %cst_12 : f32 to vector<8x1xf32>
    %24 = arith.addf %22, %23 : vector<8x1xf32>
    %cst_13 = arith.constant 0.000000e+00 : f32
    %25 = vector.broadcast %cst_13 : f32 to vector<8x1xf32>
    %26 = arith.maximumf %24, %25 : vector<8x1xf32>
    %27 = math.sqrt %26 : vector<8x1xf32>
    %28 = vector.shape_cast %10 : vector<8x1xf32> to vector<1x8x1xf32>
    %cst_14 = arith.constant dense<0.000000e+00> : vector<1xf32>
    %29 = vector.multi_reduction <add>, %28, %cst_14 [1, 2] : vector<1x8x1xf32> to vector<1xf32>
    %30 = vector.shape_cast %29 : vector<1xf32> to vector<1x1x1xf32>
    %31 = vector.extract %30[0, 0, 0] : f32 from vector<1x1x1xf32>
    %cst_15 = arith.constant 0.000000e+00 : f32
    %32 = arith.subf %cst_15, %31 : f32
    %cst_16 = arith.constant 1.250000e-01 : f32
    %33 = arith.mulf %32, %cst_16 : f32
    %34 = vector.shape_cast %27 : vector<8x1xf32> to vector<1x8x1xf32>
    %cst_17 = arith.constant dense<0.000000e+00> : vector<1xf32>
    %35 = vector.multi_reduction <add>, %34, %cst_17 [1, 2] : vector<1x8x1xf32> to vector<1xf32>
    %36 = vector.shape_cast %35 : vector<1xf32> to vector<1x1x1xf32>
    %37 = vector.extract %36[0, 0, 0] : f32 from vector<1x1x1xf32>
    %cst_18 = arith.constant 1.250000e-04 : f32
    %38 = arith.mulf %37, %cst_18 : f32
    %39 = arith.addf %33, %38 : f32
    %40 = vector.broadcast %39 : f32 to vector<1x8x128xf32>
    %c0_19 = arith.constant 0 : index
    %c0_20 = arith.constant 0 : index
    %c0_21 = arith.constant 0 : index
    %41 = vector.load %arg4[%c0_19, %c0_20, %c0_21] : memref<1x8x128xf32, #tpu.memory_space<vmem>>, vector<1x8x128xf32>
    tpu.vector_store %arg4[%c0_19, %c0_20, %c0_21], %40 {strides = array<i32>} : memref<1x8x128xf32, #tpu.memory_space<vmem>>, vector<1x8x128xf32>,
    return
  }
  func.func @transform_0(%arg0: i32) -> (i32, i32) {
    %c0_i32 = arith.constant 0 : i32
    %c0_i32_0 = arith.constant 0 : i32
    return %arg0, %c0_i32 : i32, i32
  }
  func.func @transform_1(%arg0: i32) -> (i32, i32) {
    %c0_i32 = arith.constant 0 : i32
    %c0_i32_0 = arith.constant 0 : i32
    return %arg0, %c0_i32 : i32, i32
  }
  func.func @transform_2(%arg0: i32) -> (i32, i32, i32) {
    %c0_i32 = arith.constant 0 : i32
    %c0_i32_0 = arith.constant 0 : i32
    %c0_i32_1 = arith.constant 0 : i32
    return %arg0, %c0_i32, %c0_i32_0 : i32, i32, i32
  }
  func.func @transform_3(%arg0: i32) -> (i32, i32, i32) {
    %c0_i32 = arith.constant 0 : i32
    %c0_i32_0 = arith.constant 0 : i32
    %c0_i32_1 = arith.constant 0 : i32
    return %arg0, %c0_i32, %c0_i32_0 : i32, i32, i32
  }
}

</mosaic_0001>

<bundles_post_ra>
// kernel: tpu_custom_call.1
= control target key start
LH: loop header
LB: loop body
LE: loop exit
PB: predicated region body
PF: predicated region fallthrough
CT: control target
= control target key end

     0   :  { %8 = vsyncpa [#allocation3], 0  ;;  %s1560_s0 = inlined_call_operand.vmem [shape: f32[8,16], index: 0, kind: input, shape index: {}]   ;;  %s1561_s1 = inlined_call_operand.vmem [shape: s32[8,1], index: 1, kind: input, shape index: {}]   ;;  %s1562_s2 = inlined_call_operand.hbm [shape: f32[8,32,32], index: 2, kind: input, shape index: {}]   ;;  %s1563_s3 = inlined_call_operand.hbm [shape: f32[1,8,128], index: 3, kind: output, shape index: {}]  }
   0x1   :  { %9 = vsyncpa [#allocation4], 0  ;;  %s18_s14 = sshll.u32 %s1562_s2, 4  ;;  %s1065_s15 = smov [#allocation2]   ;;  %s19_s14 = int_to_ptr.hbm [resolvable:$true] %s18_s14 }
   0x2   :  { %s20_s16 = sshll.u32 %s1065_s15, 4  ;;  %s1066_s17 = smov 128   ;;  %s21_s16 = int_to_ptr.vmem [resolvable:$true] %s20_s16 }
   0x3   :  { %s1067_s18 = smov 8  }
   0x4   :  { %26 = dma.hbm_to_vmem [thread:$0]  %s19_s14, 4096, %s21_s16, [#allocation3], %s1066_s17, %s1066_s17, %s1067_s18  }
   0x5   :  { %1061 = dma.done.wait [#allocation3], 4096  }
   0x6   :  { %1062 = vsyncadd [#allocation3], 4294963200  ;;  %vm78_vm0 = vcmask 261120   ;;  %v1094_v0 = vld [vmem:[#allocation2 + $0x18] sm:$0xff]  ;;  %v33_v4 = vld [vmem:[#allocation2] sm:$0xff]  ;;  %vm570_vm1 = vcmask 130112  }
   0x7   :  { %v1096_v1 = vld [vmem:[#allocation2 + $0x38] sm:$0xff]  ;;  %935 = vmatpush.xpose.msk.msra.mxu0 %vm78_vm0, %v1094_v0  ;;  %v1106_v5 = vld [vmem:[#allocation2 + $0x10] sm:$0xff]  ;;  %v647_v6 = vmul.f32 %v33_v4, %v33_v4  ;;  %v1118_v10 = vld [vmem:[#allocation2 + $0x8] sm:$0xff]  ;;  %v650_v41 = vmul.f32 %v1094_v0, %v1094_v0  ;;  %vm574_vm2 = vcmask 195712   ;;  %vm578_vm3 = vcmask 261312   ;;  %s1070_s22 = smov [#allocation5]  }
   0x8   :  { %v1098_v2 = vld [vmem:[#allocation2 + $0x58] sm:$0xff]  ;;  %943 = vmatpush.xpose.msk.msra.mxu1 %vm78_vm0, %v1096_v1  ;;  %v649_v7 = vmul.f32 %v1106_v5, %v1106_v5  ;;  %v1114_v8 = vld [vmem:[#allocation2 + $0x30] sm:$0xff]  ;;  %v37_v13 = vld [vmem:[#allocation2 + $0x20] sm:$0xff]  ;;  %v648_v16 = vmul.f32 %v1118_v10, %v1118_v10  ;;  %v654_v45 = vmul.f32 %v1096_v1, %v1096_v1  ;;  %vm629_vm4 = vcmask 1041409   ;;  %s922_s23 = sshll.u32 %s1070_s22, 4  ;;  %s924_s29 = sshll.u32 %s1563_s3, 4  ;;  %s923_s23 = int_to_ptr.vmem [resolvable:$true] %s922_s23  ;;  %s925_s29 = int_to_ptr.hbm [resolvable:$true] %s924_s29 }
   0x9   :  { %v1104_v3 = vld [vmem:[#allocation2 + $0x78] sm:$0xff]  ;;  %951 = vmatpush.xpose.msk.msra.mxu2 %vm78_vm0, %v1098_v2  ;;  %v1116_v9 = vld [vmem:[#allocation2 + $0x50] sm:$0xff]  ;;  %v679_v11 = vsel %vm78_vm0, %v647_v6, 0.0  ;;  %v651_v14 = vmul.f32 %v37_v13, %v37_v13  ;;  %v38_v17 = vld [vmem:[#allocation2 + $0x28] sm:$0xff]  ;;  %v653_v27 = vmul.f32 %v1114_v8, %v1114_v8  ;;  %v688_v48 = vsel %vm78_vm0, %v650_v41, 0.0 }
   0xa   :  { %959 = vmatpush.xpose.msk.msra.mxu3 %vm78_vm0, %v1104_v3  ;;  %v1121_v12 = vld [vmem:[#allocation2 + $0x70] sm:$0xff]  ;;  %680 = vadd.xlane.f32.xlu0 %v679_v11  ;;  %v685_v15 = vsel %vm78_vm0, %v649_v7, 0.0  ;;  %v42_v18 = vld [vmem:[#allocation2 + $0x48] sm:$0xff]  ;;  %v652_v21 = vmul.f32 %v38_v17, %v38_v17  ;;  %v682_v22 = vsel %vm78_vm0, %v648_v16, 0.0  ;;  %v41_v23 = vld [vmem:[#allocation2 + $0x40] sm:$0xff]  ;;  %v657_v40 = vmul.f32 %v1116_v9, %v1116_v9 }
   0xb   :  { %936 = vmatpush.xpose.msk.msra.mxu0 %vm78_vm0, %v1106_v5  ;;  %v691_v19 = vsel %vm78_vm0, %v651_v14, 0.0  ;;  %686 = vadd.xlane.f32.xlu2 %v685_v15  ;;  %v1135_v20 = vld [vmem:[#allocation2 + $0x68] sm:$0xff]  ;;  %v45_v24 = vld [vmem:[#allocation2 + $0x60] sm:$0xff]  ;;  %v1144_v25 = vld [vmem:[#allocation2 + $0xd8] sm:$0xff]  ;;  %v655_v28 = vmul.f32 %v41_v23, %v41_v23  ;;  %v656_v32 = vmul.f32 %v42_v18, %v42_v18  ;;  %v697_v34 = vsel %vm78_vm0, %v653_v27, 0.0 }
   0xc   :  { %944 = vmatpush.xpose.msk.msra.mxu1 %vm78_vm0, %v1114_v8  ;;  %692 = vadd.xlane.f32.xlu1 %v691_v19  ;;  %v694_v26 = vsel %vm78_vm0, %v652_v21, 0.0  ;;  %v1155_v29 = vld [vmem:[#allocation2 + $0x98] sm:$0xff]  ;;  %v1158_v30 = vld [vmem:[#allocation2 + $0xd0] sm:$0xff]  ;;  %v1179_v37 = vld [vmem:[#allocation2 + $0xc8] sm:$0xff]  ;;  %v709_v47 = vsel %vm78_vm0, %v657_v40, 0.0  ;;  %v700_v51 = vsel %vm78_vm0, %v654_v45, 0.0  ;;  %v659_v53 = vmul.f32 %v45_v24, %v45_v24 }
   0xd   :  { %952 = vmatpush.xpose.msk.msra.mxu2 %vm78_vm0, %v1116_v9  ;;  %v1160_v31 = vld [vmem:[#allocation2 + $0xb8] sm:$0xff]  ;;  %v703_v35 = vsel %vm78_vm0, %v655_v28, 0.0  ;;  %v1175_v36 = vld [vmem:[#allocation2 + $0x90] sm:$0xff]  ;;  %v706_v39 = vsel %vm78_vm0, %v656_v32, 0.0  ;;  %v1194_v42 = vld [vmem:[#allocation2 + $0x88] sm:$0xff]  ;;  %v660_v56 = vmul.f32 %v1135_v20, %v1135_v20  ;;  %v658_v61 = vmul.f32 %v1098_v2, %v1098_v2 }
   0xe   :  { %960 = vmatpush.xpose.msk.msra.mxu3 %vm78_vm0, %v1121_v12  ;;  %v1164_v33 = vld [vmem:[#allocation2 + $0xf8] sm:$0xff]  ;;  %v1181_v38 = vld [vmem:[#allocation2 + $0xb0] sm:$0xff]  ;;  %v1198_v43 = vld [vmem:[#allocation2 + $0xc0] sm:$0xff]  ;;  %v715_v58 = vsel %vm78_vm0, %v659_v53, 0.0  ;;  %v661_v62 = vmul.f32 %v1121_v12, %v1121_v12  ;;  %v673_v14 = vmul.f32 %v1158_v30, %v1158_v30  ;;  %v670_v16 = vmul.f32 %v1160_v31, %v1160_v31 }
   0xf   :  { %937 = vmatpush.xpose.msk.msra.mxu0 %vm78_vm0, %v1118_v10  ;;  %v1200_v44 = vld [vmem:[#allocation2 + $0xf0] sm:$0xff]  ;;  %v1206_v46 = vld [vmem:[#allocation2 + $0xa8] sm:$0xff]  ;;  %v49_v49 = vld [vmem:[#allocation2 + $0x80] sm:$0xff]  ;;  %v718_v59 = vsel %vm78_vm0, %v660_v56, 0.0  ;;  %v671_v11 = vmul.f32 %v1198_v43, %v1198_v43  ;;  %vm631_vm5 = vcmask 1042434   ;;  %vm633_vm6 = vcmask 1043459  }
  0x10   :  { %945 = vmatpush.xpose.msk.msra.mxu1 %vm78_vm0, %v38_v17  ;;  %v1220_v50 = vld [vmem:[#allocation2 + $0xe8] sm:$0xff]  ;;  %v663_v52 = vmul.f32 %v49_v49, %v49_v49  ;;  %v53_v54 = vld [vmem:[#allocation2 + $0xa0] sm:$0xff]  ;;  %v668_v15 = vmul.f32 %v1206_v46, %v1206_v46  ;;  %v748_v19 = vsel %vm78_vm0, %v670_v16, 0.0  ;;  %vm635_vm7 = vcmask 1044484  }
  0x11   :  { %953 = vmatpush.xpose.msk.msra.mxu2 %vm78_vm0, %v42_v18  ;;  %v1228_v55 = vld [vmem:[#allocation2 + $0xe0] sm:$0xff]  ;;  %v667_v60 = vmul.f32 %v53_v54, %v53_v54  ;;  %v676_v21 = vmul.f32 %v1220_v50, %v1220_v50  ;;  %vm637_vm8 = vcmask 1045509   ;;  %vm639_vm9 = vcmask 1046534  }
  0x12   :  { %961 = vmatpush.xpose.msk.msra.mxu3 %vm78_vm0, %v1135_v20  ;;  %683 = vadd.xlane.f32.xlu0 %v682_v22  ;;  %v727_v57 = vsel %vm78_vm0, %v663_v52, 0.0  ;;  %vm641_vm10 = vcmask 1047559   ;;  %vm74_vm12 = vcmask 130048   ;;  %vm890_vm13 = vcmask 7168  }
  0x13   :  { %938 = vmatpush.xpose.msk.msra.mxu0 %vm78_vm0, %v33_v4  ;;  %698 = vadd.xlane.f32.xlu2 %v697_v34  ;;  %v739_v63 = vsel %vm78_vm0, %v667_v60, 0.0  ;;  %v65_v34 = vlaneseq }
  0x14   :  { %946 = vmatpush.xpose.msk.msra.mxu1 %vm78_vm0, %v37_v13  ;;  %695 = vadd.xlane.f32.xlu1 %v694_v26  ;;  %v677_v26 = vmul.f32 %v1200_v44, %v1200_v44 }
  0x15   :  { %954 = vmatpush.xpose.msk.msra.mxu2 %vm78_vm0, %v41_v23 }
  0x16   :  { %962 = vmatpush.xpose.msk.msra.mxu3 %vm78_vm0, %v45_v24  ;;  %939 = vmatmul.msk.f32.vlgmr.msra.gmra.mxu0 %vm78_vm0, %v33_v4  ;;  %v712_v4 = vsel %vm78_vm0, %v658_v61, 0.0  ;;  %v769_v28 = vsel %vm78_vm0, %v677_v26, 0.0 }
  0x17   :  { %947 = vmatmul.msk.f32.vlgmr.msra.gmra.mxu1 %vm78_vm0, %v37_v13  ;;  %967 = vmatpush.xpose.msk.msrb.mxu0 %vm78_vm0, %v1155_v29 }
  0x18   :  { %955 = vmatmul.msk.f32.vlgmr.msra.gmra.mxu2 %vm78_vm0, %v41_v23  ;;  %975 = vmatpush.xpose.msk.msrb.mxu1 %vm78_vm0, %v1160_v31  ;;  %v766_v23 = vsel %vm78_vm0, %v676_v21, 0.0 }
  0x19   :  { %983 = vmatpush.xpose.msk.msrb.mxu2 %vm78_vm0, %v1144_v25  ;;  %963 = vmatmul.msk.f32.vlgmr.msra.gmra.mxu3 %vm78_vm0, %v45_v24  ;;  %v675_v24 = vmul.f32 %v1228_v55, %v1228_v55 }
  0x1a   :  { %991 = vmatpush.xpose.msk.msrb.mxu3 %vm78_vm0, %v1164_v33  ;;  %704 = vadd.xlane.f32.xlu0 %v703_v35 }
  0x1b   :  { %968 = vmatpush.xpose.msk.msrb.mxu0 %vm78_vm0, %v1175_v36  ;;  %710 = vadd.xlane.f32.xlu2 %v709_v47  ;;  %v763_v27 = vsel %vm78_vm0, %v675_v24, 0.0 }
  0x1c   :  { %976 = vmatpush.xpose.msk.msrb.mxu1 %vm78_vm0, %v1181_v38  ;;  %707 = vadd.xlane.f32.xlu1 %v706_v39 }
  0x1d   :  { %984 = vmatpush.xpose.msk.msrb.mxu2 %vm78_vm0, %v1158_v30 }
  0x1e   :  { %940 = vmatmul.msk.f32.gmra.mxu0 %vm78_vm0, %v1118_v10  ;;  %992 = vmatpush.xpose.msk.msrb.mxu3 %vm78_vm0, %v1200_v44  ;;  %v662_v10 = vmul.f32 %v1104_v3, %v1104_v3 }
  0x1f   :  { %948 = vmatmul.msk.f32.gmra.mxu1 %vm78_vm0, %v38_v17  ;;  %969 = vmatpush.xpose.msk.msrb.mxu0 %vm78_vm0, %v1194_v42  ;;  %v757_v17 = vsel %vm78_vm0, %v673_v14, 0.0 }
  0x20   :  { %956 = vmatmul.msk.f32.gmra.mxu2 %vm78_vm0, %v42_v18  ;;  %977 = vmatpush.xpose.msk.msrb.mxu1 %vm78_vm0, %v1206_v46  ;;  %v724_v13 = vsel %vm78_vm0, %v662_v10, 0.0  ;;  %v742_v18 = vsel %vm78_vm0, %v668_v15, 0.0 }
  0x21   :  { %985 = vmatpush.xpose.msk.msrb.mxu2 %vm78_vm0, %v1179_v37  ;;  %964 = vmatmul.msk.f32.gmra.mxu3 %vm78_vm0, %v1135_v20  ;;  %v669_v20 = vmul.f32 %v1181_v38, %v1181_v38 }
  0x22   :  { %689 = vadd.xlane.f32.xlu0 %v688_v48  ;;  %993 = vmatpush.xpose.msk.msrb.mxu3 %vm78_vm0, %v1220_v50 }
  0x23   :  { %970 = vmatpush.xpose.msk.msrb.mxu0 %vm78_vm0, %v49_v49  ;;  %728 = vadd.xlane.f32.xlu2 %v727_v57  ;;  %v745_v22 = vsel %vm78_vm0, %v669_v20, 0.0 }
  0x24   :  { %701 = vadd.xlane.f32.xlu1 %v700_v51  ;;  %978 = vmatpush.xpose.msk.msrb.mxu1 %vm78_vm0, %v53_v54 }
  0x25   :  { %986 = vmatpush.xpose.msk.msrb.mxu2 %vm78_vm0, %v1198_v43 }
  0x26   :  { %941 = vmatmul.msk.f32.gmra.mxu0 %vm78_vm0, %v1106_v5  ;;  %994 = vmatpush.xpose.msk.msrb.mxu3 %vm78_vm0, %v1228_v55  ;;  %v665_v5 = vmul.f32 %v1175_v36, %v1175_v36 }
  0x27   :  { %949 = vmatmul.msk.f32.gmra.mxu1 %vm78_vm0, %v1114_v8 }
  0x28   :  { %957 = vmatmul.msk.f32.gmra.mxu2 %vm78_vm0, %v1116_v9  ;;  %v733_v8 = vsel %vm78_vm0, %v665_v5, 0.0  ;;  %v672_v9 = vmul.f32 %v1179_v37, %v1179_v37 }
  0x29   :  { %965 = vmatmul.msk.f32.gmra.mxu3 %vm78_vm0, %v1121_v12 }
  0x2a   :  { %716 = vadd.xlane.f32.xlu0 %v715_v58  ;;  %v754_v12 = vsel %vm78_vm0, %v672_v9, 0.0 }
  0x2b   :  { %740 = vadd.xlane.f32.xlu2 %v739_v63 }
  0x2c   :  { %719 = vadd.xlane.f32.xlu1 %v718_v59 }
  0x2e   :  { %942 = vmatmul.msk.f32.gmra.mxu0 %vm78_vm0, %v1094_v0  ;;  %v721_v0 = vsel %vm78_vm0, %v661_v62, 0.0 }
  0x2f   :  { %950 = vmatmul.msk.f32.gmra.mxu1 %vm78_vm0, %v1096_v1  ;;  %v664_v1 = vmul.f32 %v1194_v42, %v1194_v42 }
  0x30   :  { %958 = vmatmul.msk.f32.gmra.mxu2 %vm78_vm0, %v1098_v2  ;;  %v666_v2 = vmul.f32 %v1155_v29, %v1155_v29 }
  0x31   :  { %966 = vmatmul.msk.f32.gmra.mxu3 %vm78_vm0, %v1104_v3  ;;  %v730_v7 = vsel %vm78_vm0, %v664_v1, 0.0  ;;  %v751_v3 = vsel %vm78_vm0, %v671_v11, 0.0 }
  0x32   :  { %713 = vadd.xlane.f32.xlu0 %v712_v4  ;;  %v736_v6 = vsel %vm78_vm0, %v666_v2, 0.0 }
  0x33   :  { %737 = vadd.xlane.f32.xlu2 %v736_v6 }
  0x34   :  { %722 = vadd.xlane.f32.xlu1 %v721_v0 }
  0x36   :  { %971 = vmatmul.msk.f32.vlgmr.msrb.gmra.mxu0 %vm78_vm0, %v49_v49 }
  0x37   :  { %979 = vmatmul.msk.f32.vlgmr.msrb.gmra.mxu1 %vm78_vm0, %v53_v54 }
  0x38   :  { %987 = vmatmul.msk.f32.vlgmr.msrb.gmra.mxu2 %vm78_vm0, %v1198_v43 }
  0x39   :  { %995 = vmatmul.msk.f32.vlgmr.msrb.gmra.mxu3 %vm78_vm0, %v1228_v55 }
  0x3a   :  { %731 = vadd.xlane.f32.xlu0 %v730_v7 }
  0x3b   :  { %755 = vadd.xlane.f32.xlu2 %v754_v12 }
  0x3c   :  { %734 = vadd.xlane.f32.xlu1 %v733_v8 }
  0x3e   :  { %972 = vmatmul.msk.f32.gmra.mxu0 %vm78_vm0, %v1194_v42 }
  0x3f   :  { %980 = vmatmul.msk.f32.gmra.mxu1 %vm78_vm0, %v1206_v46 }
  0x40   :  { %988 = vmatmul.msk.f32.gmra.mxu2 %vm78_vm0, %v1179_v37 }
  0x41   :  { %996 = vmatmul.msk.f32.gmra.mxu3 %vm78_vm0, %v1220_v50 }
  0x42   :  { %725 = vadd.xlane.f32.xlu0 %v724_v13 }
  0x43   :  { %758 = vadd.xlane.f32.xlu2 %v757_v17 }
  0x44   :  { %752 = vadd.xlane.f32.xlu1 %v751_v3 }
  0x46   :  { %973 = vmatmul.msk.f32.gmra.mxu0 %vm78_vm0, %v1175_v36  ;;  %v1334_v36 = vand.u32 127, %v65_v34 }
  0x47   :  { %981 = vmatmul.msk.f32.gmra.mxu1 %vm78_vm0, %v1181_v38 }
  0x48   :  { %989 = vmatmul.msk.f32.gmra.mxu2 %vm78_vm0, %v1158_v30  ;;  %v1337_v38 = vadd.s32 4294967288, %v1334_v36  ;;  %v1346_v47 = vadd.s32 4294967280, %v1334_v36  ;;  %v1350_v51 = vadd.s32 4294967272, %v1334_v36 }
  0x49   :  { %997 = vmatmul.msk.f32.gmra.mxu3 %vm78_vm0, %v1200_v44 }
  0x4a   :  { %743 = vadd.xlane.f32.xlu0 %v742_v18 }
  0x4c   :  { %749 = vadd.xlane.f32.xlu1 %v748_v19 }
  0x4e   :  { %974 = vmatmul.msk.f32.gmra.mxu0 %vm78_vm0, %v1155_v29  ;;  %v674_v29 = vmul.f32 %v1144_v25, %v1144_v25 }
  0x4f   :  { %982 = vmatmul.msk.f32.gmra.mxu1 %vm78_vm0, %v1160_v31  ;;  %v678_v31 = vmul.f32 %v1164_v33, %v1164_v33 }
  0x50   :  { %990 = vmatmul.msk.f32.gmra.mxu2 %vm78_vm0, %v1144_v25  ;;  %v760_v30 = vsel %vm78_vm0, %v674_v29, 0.0 }
  0x51   :  { %998 = vmatmul.msk.f32.gmra.mxu3 %vm78_vm0, %v1164_v33  ;;  %v772_v32 = vsel %vm78_vm0, %v678_v31, 0.0 }
  0x52   :  { %746 = vadd.xlane.f32.xlu0 %v745_v22 }
  0x54   :  { %767 = vadd.xlane.f32.xlu1 %v766_v23 }
  0x5a   :  { %764 = vadd.xlane.f32.xlu0 %v763_v27 }
  0x5c   :  { %770 = vadd.xlane.f32.xlu1 %v769_v28 }
  0x62   :  { %761 = vadd.xlane.f32.xlu0 %v760_v30 }
  0x6a   :  { %773 = vadd.xlane.f32.xlu0 %v772_v32 }
  0x7d   :  { %v681_v35 = vpop.xlane.xlu0 %680 }
  0x7e   :  { %v807_v25 = vperm.slane %v681_v35, %v1334_v36  ;;  %v687_v44 = vpop.xlane.xlu2 %686 }
  0x7f   :  { %v693_v37 = vpop.xlane.xlu1 %692  ;;  %v810_v49 = vperm.slane %v687_v44, %v1346_v47 }
  0x80   :  { %v814_v41 = vperm.slane %v693_v37, %v1334_v36 }
  0x85   :  { %v684_v39 = vpop.xlane.xlu0 %683 }
  0x86   :  { %v808_v40 = vperm.slane %v684_v39, %v1337_v38  ;;  %v699_v54 = vpop.xlane.xlu2 %698 }
  0x87   :  { %v696_v42 = vpop.xlane.xlu1 %695  ;;  %v817_v56 = vperm.slane %v699_v54, %v1346_v47 }
  0x88   :  { %v809_v33 = vsel %vm570_vm1, %v808_v40, %v807_v25  ;;  %v815_v43 = vperm.slane %v696_v42, %v1337_v38 }
  0x89   :  { %v811_v59 = vsel %vm574_vm2, %v810_v49, %v809_v33 }
  0x8a   :  { %v816_v45 = vsel %vm570_vm1, %v815_v43, %v814_v41 }
  0x8b   :  { %v818_v4 = vsel %vm574_vm2, %v817_v56, %v816_v45 }
  0x8d   :  { %v705_v46 = vpop.xlane.xlu0 %704 }
  0x8e   :  { %v821_v14 = vperm.slane %v705_v46, %v1334_v36  ;;  %v711_v18 = vpop.xlane.xlu2 %710 }
  0x8f   :  { %v708_v48 = vpop.xlane.xlu1 %707  ;;  %v824_v20 = vperm.slane %v711_v18, %v1346_v47 }
  0x90   :  { %v822_v15 = vperm.slane %v708_v48, %v1337_v38 }
  0x92   :  { %v823_v21 = vsel %vm570_vm1, %v822_v15, %v821_v14 }
  0x93   :  { %v108_v50 = vpop.f32.mrf.mxu0  ;;  %v825_v31 = vsel %vm574_vm2, %v824_v20, %v823_v21 }
  0x94   :  { %v407_v52 = vmul.f32 %v108_v50, %v108_v50  ;;  %v149_v53 = vpop.f32.mrf.mxu1 }
  0x95   :  { %v411_v55 = vmul.f32 %v149_v53, %v149_v53  ;;  %v690_v57 = vpop.xlane.xlu0 %689 }
  0x96   :  { %v439_v58 = vsel %vm78_vm0, %v407_v52, 0.0  ;;  %v812_v60 = vperm.slane %v690_v57, %v1350_v51 }
  0x97   :  { %v451_v61 = vsel %vm78_vm0, %v411_v55, 0.0  ;;  %440 = vadd.xlane.f32.xlu2 %v439_v58  ;;  %v702_v63 = vpop.xlane.xlu1 %701 }
  0x98   :  { %452 = vadd.xlane.f32.xlu1 %v451_v61  ;;  %v813_v62 = vsel %vm578_vm3, %v812_v60, %v811_v59  ;;  %v819_v2 = vperm.slane %v702_v63, %v1350_v51 }
  0x9a   :  { %v820_v9 = vsel %vm578_vm3, %v819_v2, %v818_v4 }
  0x9b   :  { %v190_v0 = vpop.f32.mrf.mxu2  ;;  %v111_v1 = vpop.f32.mrf.mxu0  ;;  %v863_v12 = vsel %vm629_vm4, %v820_v9, %v813_v62 }
  0x9c   :  { %v415_v5 = vmul.f32 %v190_v0, %v190_v0  ;;  %v231_v6 = vpop.f32.mrf.mxu3  ;;  %v408_v7 = vmul.f32 %v111_v1, %v111_v1  ;;  %v152_v8 = vpop.f32.mrf.mxu1 }
  0x9d   :  { %v412_v10 = vmul.f32 %v152_v8, %v152_v8  ;;  %v1363_v13 = vpop.xlane.xlu0 %716  ;;  %v419_v17 = vmul.f32 %v231_v6, %v231_v6 }
  0x9e   :  { %v463_v11 = vsel %vm78_vm0, %v415_v5, 0.0  ;;  %v442_v3 = vsel %vm78_vm0, %v408_v7, 0.0 }
  0x9f   :  { %v454_v16 = vsel %vm78_vm0, %v412_v10, 0.0  ;;  %443 = vadd.xlane.f32.xlu0 %v442_v3  ;;  %v475_v28 = vsel %vm78_vm0, %v419_v17, 0.0  ;;  %v1383_v55 = vpop.xlane.xlu1 %719  ;;  %v1399_v17 = vpop.xlane.xlu2 %728 }
  0xa0   :  { %464 = vadd.xlane.f32.xlu1 %v463_v11  ;;  %455 = vadd.xlane.f32.xlu2 %v454_v16 }
  0xa3   :  { %v193_v19 = vpop.f32.mrf.mxu2  ;;  %v114_v22 = vpop.f32.mrf.mxu0 }
  0xa4   :  { %v416_v23 = vmul.f32 %v193_v19, %v193_v19  ;;  %v234_v24 = vpop.f32.mrf.mxu3  ;;  %v155_v26 = vpop.f32.mrf.mxu1  ;;  %v409_v48 = vmul.f32 %v114_v22, %v114_v22 }
  0xa5   :  { %v413_v27 = vmul.f32 %v155_v26, %v155_v26  ;;  %v714_v30 = vpop.xlane.xlu0 %713  ;;  %v420_v35 = vmul.f32 %v234_v24, %v234_v24 }
  0xa6   :  { %v466_v29 = vsel %vm78_vm0, %v416_v23, 0.0  ;;  %v826_v32 = vperm.slane %v714_v30, %v1350_v51  ;;  %v445_v56 = vsel %vm78_vm0, %v409_v48, 0.0 }
  0xa7   :  { %v457_v34 = vsel %vm78_vm0, %v413_v27, 0.0  ;;  %v478_v44 = vsel %vm78_vm0, %v420_v35, 0.0  ;;  %v1393_v7 = vpop.xlane.xlu1 %722 }
  0xa8   :  { %476 = vadd.xlane.f32.xlu1 %v475_v28  ;;  %467 = vadd.xlane.f32.xlu2 %v466_v29  ;;  %v827_v37 = vsel %vm578_vm3, %v826_v32, %v825_v31  ;;  %v1411_v32 = vpop.xlane.xlu2 %740 }
  0xa9   :  { %458 = vadd.xlane.f32.xlu0 %v457_v34  ;;  %v1378_v39 = vsel %vm631_vm5, %v827_v37, %v863_v12 }
  0xab   :  { %v196_v25 = vpop.f32.mrf.mxu2  ;;  %v117_v40 = vpop.f32.mrf.mxu0 }
  0xac   :  { %v417_v41 = vmul.f32 %v196_v25, %v196_v25  ;;  %v237_v33 = vpop.f32.mrf.mxu3  ;;  %v410_v42 = vmul.f32 %v117_v40, %v117_v40  ;;  %v158_v43 = vpop.f32.mrf.mxu1 }
  0xad   :  { %v1387_v58 = vpop.xlane.xlu0 %731  ;;  %v421_v61 = vmul.f32 %v237_v33, %v237_v33  ;;  %v414_v9 = vmul.f32 %v158_v43, %v158_v43 }
  0xae   :  { %v469_v45 = vsel %vm78_vm0, %v417_v41, 0.0  ;;  %v448_v46 = vsel %vm78_vm0, %v410_v42, 0.0 }
  0xaf   :  { %v481_v0 = vsel %vm78_vm0, %v421_v61, 0.0  ;;  %v460_v14 = vsel %vm78_vm0, %v414_v9, 0.0  ;;  %v1402_v20 = vpop.xlane.xlu1 %734  ;;  %v835_v9 = vperm.slane %v1399_v17, %v1334_v36 }
  0xb0   :  { %479 = vadd.xlane.f32.xlu2 %v478_v44  ;;  %449 = vadd.xlane.f32.xlu1 %v448_v46  ;;  %v738_v48 = vpop.xlane.xlu2 %737 }
  0xb1   :  { %470 = vadd.xlane.f32.xlu0 %v469_v45 }
  0xb3   :  { %v199_v49 = vpop.f32.mrf.mxu2  ;;  %v272_v60 = vpop.f32.mrf.mxu0 }
  0xb4   :  { %v418_v50 = vmul.f32 %v199_v49, %v199_v49  ;;  %v240_v52 = vpop.f32.mrf.mxu3  ;;  %v313_v54 = vpop.f32.mrf.mxu1  ;;  %v423_v63 = vmul.f32 %v272_v60, %v272_v60 }
  0xb5   :  { %v422_v53 = vmul.f32 %v240_v52, %v240_v52  ;;  %v1395_v8 = vpop.xlane.xlu0 %725  ;;  %v427_v21 = vmul.f32 %v313_v54, %v313_v54 }
  0xb6   :  { %v472_v57 = vsel %vm78_vm0, %v418_v50, 0.0  ;;  %v487_v6 = vsel %vm78_vm0, %v423_v63, 0.0 }
  0xb7   :  { %v484_v59 = vsel %vm78_vm0, %v422_v53, 0.0  ;;  %v499_v27 = vsel %vm78_vm0, %v427_v21, 0.0  ;;  %v1413_v25 = vpop.xlane.xlu1 %752 }
  0xb8   :  { %446 = vadd.xlane.f32.xlu2 %v445_v56  ;;  %473 = vadd.xlane.f32.xlu1 %v472_v57  ;;  %v756_v60 = vpop.xlane.xlu2 %755 }
  0xb9   :  { %485 = vadd.xlane.f32.xlu0 %v484_v59 }
  0xbb   :  { %v354_v62 = vpop.f32.mrf.mxu2  ;;  %v275_v3 = vpop.f32.mrf.mxu0 }
  0xbc   :  { %v431_v4 = vmul.f32 %v354_v62, %v354_v62  ;;  %v395_v1 = vpop.f32.mrf.mxu3  ;;  %v316_v5 = vpop.f32.mrf.mxu1  ;;  %v424_v22 = vmul.f32 %v275_v3, %v275_v3 }
  0xbd   :  { %v435_v10 = vmul.f32 %v395_v1, %v395_v1  ;;  %v428_v11 = vmul.f32 %v316_v5, %v316_v5  ;;  %v1404_v23 = vpop.xlane.xlu0 %743  ;;  %v836_v5 = vperm.slane %v1387_v58, %v1337_v38 }
  0xbe   :  { %v511_v2 = vsel %vm78_vm0, %v431_v4, 0.0  ;;  %v490_v28 = vsel %vm78_vm0, %v424_v22, 0.0  ;;  %v828_v4 = vperm.slane %v1363_v13, %v1334_v36  ;;  %v842_v13 = vperm.slane %v1411_v32, %v1334_v36 }
  0xbf   :  { %v523_v15 = vsel %vm78_vm0, %v435_v10, 0.0  ;;  %v502_v18 = vsel %vm78_vm0, %v428_v11, 0.0  ;;  %v1420_v50 = vpop.xlane.xlu1 %749  ;;  %v838_v11 = vperm.slane %v1402_v20, %v1346_v47  ;;  %v843_v58 = vperm.slane %v1404_v23, %v1337_v38 }
  0xc0   :  { %482 = vadd.xlane.f32.xlu2 %v481_v0  ;;  %512 = vadd.xlane.f32.xlu1 %v511_v2  ;;  %v829_v0 = vperm.slane %v1383_v55, %v1337_v38  ;;  %v833_v55 = vperm.slane %v1395_v8, %v1350_v51  ;;  %v850_v8 = vperm.slane %v756_v60, %v1337_v38 }
  0xc1   :  { %488 = vadd.xlane.f32.xlu0 %v487_v6  ;;  %v831_v6 = vperm.slane %v1393_v7, %v1346_v47  ;;  %v1068_v7 = vmov 0   ;;  %v840_v20 = vperm.slane %v738_v48, %v1350_v51 }
  0xc2   :  { %v830_v10 = vsel %vm570_vm1, %v829_v0, %v828_v4  ;;  %1009 = vset.pattern.permute.xlu1 %v1068_v7  ;;  %1010 = vset.pattern.permute.xlu0 %v1068_v7 }
  0xc3   :  { %v357_v12 = vpop.f32.mrf.mxu2  ;;  %v278_v31 = vpop.f32.mrf.mxu0  ;;  %v832_v3 = vsel %vm574_vm2, %v831_v6, %v830_v10 }
  0xc4   :  { %v398_v16 = vpop.f32.mrf.mxu3  ;;  %v319_v19 = vpop.f32.mrf.mxu1  ;;  %v432_v34 = vmul.f32 %v357_v12, %v357_v12  ;;  %v425_v35 = vmul.f32 %v278_v31, %v278_v31  ;;  %v834_v22 = vsel %vm578_vm3, %v833_v55, %v832_v3  ;;  %v847_v31 = vperm.slane %v1420_v50, %v1350_v51 }
  0xc5   :  { %v429_v24 = vmul.f32 %v319_v19, %v319_v19  ;;  %v1415_v40 = vpop.xlane.xlu0 %746  ;;  %v436_v46 = vmul.f32 %v398_v16, %v398_v16  ;;  %v759_v16 = vpop.xlane.xlu2 %758 }
  0xc6   :  { %v514_v41 = vsel %vm78_vm0, %v432_v34, 0.0  ;;  %v493_v33 = vsel %vm78_vm0, %v425_v35, 0.0  ;;  %v845_v21 = vperm.slane %v1415_v40, %v1346_v47  ;;  %v865_v35 = vsel %vm633_vm6, %v834_v22, %v1378_v39 }
  0xc7   :  { %v505_v30 = vsel %vm78_vm0, %v429_v24, 0.0  ;;  %v526_v52 = vsel %vm78_vm0, %v436_v46, 0.0  ;;  %v768_v61 = vpop.xlane.xlu1 %767  ;;  %v844_v24 = vsel %vm570_vm1, %v843_v58, %v842_v13 }
  0xc8   :  { %461 = vadd.xlane.f32.xlu2 %v460_v14  ;;  %524 = vadd.xlane.f32.xlu1 %v523_v15  ;;  %v837_v14 = vsel %vm570_vm1, %v836_v5, %v835_v9  ;;  %v849_v15 = vperm.slane %v1413_v25, %v1334_v36  ;;  %v846_v25 = vsel %vm574_vm2, %v845_v21, %v844_v24 }
  0xc9   :  { %503 = vadd.xlane.f32.xlu0 %v502_v18  ;;  %v857_v18 = vperm.slane %v768_v61, %v1337_v38  ;;  %v839_v23 = vsel %vm574_vm2, %v838_v11, %v837_v14  ;;  %v848_v39 = vsel %vm578_vm3, %v847_v31, %v846_v25 }
  0xcb   :  { %v360_v26 = vpop.f32.mrf.mxu2  ;;  %v281_v56 = vpop.f32.mrf.mxu0 }
  0xcc   :  { %v1408_v29 = vpop.f32.mrf.mxu3  ;;  %v433_v37 = vmul.f32 %v360_v26, %v360_v26  ;;  %v426_v59 = vmul.f32 %v281_v56, %v281_v56  ;;  %v322_v63 = vpop.f32.mrf.mxu1  ;;  %v852_v26 = vperm.slane %v759_v16, %v1346_v47 }
  0xcd   :  { %v765_v54 = vpop.xlane.xlu0 %764  ;;  %v430_v1 = vmul.f32 %v322_v63, %v322_v63  ;;  %v437_v34 = vmul.f32 %v1408_v29, %v1408_v29 }
  0xce   :  { %v517_v42 = vsel %vm78_vm0, %v433_v37, 0.0  ;;  %v496_v62 = vsel %vm78_vm0, %v426_v59, 0.0  ;;  %v856_v17 = vperm.slane %v765_v54, %v1334_v36  ;;  %v841_v37 = vsel %vm578_vm3, %v840_v20, %v839_v23 }
  0xcf   :  { %v508_v12 = vsel %vm78_vm0, %v430_v1, 0.0  ;;  %v771_v19 = vpop.xlane.xlu1 %770  ;;  %v866_v29 = vsel %vm635_vm7, %v841_v37, %v865_v35 }
  0xd0   :  { %500 = vadd.xlane.f32.xlu2 %v499_v27  ;;  %491 = vadd.xlane.f32.xlu1 %v490_v28  ;;  %v851_v27 = vsel %vm570_vm1, %v850_v8, %v849_v15  ;;  %v859_v28 = vperm.slane %v771_v19, %v1346_v47  ;;  %v858_v32 = vsel %vm570_vm1, %v857_v18, %v856_v17 }
  0xd1   :  { %506 = vadd.xlane.f32.xlu0 %v505_v30  ;;  %v867_v48 = vsel %vm637_vm8, %v848_v39, %v866_v29 }
  0xd3   :  { %v363_v43 = vpop.f32.mrf.mxu2 }
  0xd4   :  { %v404_v44 = vpop.f32.mrf.mxu3  ;;  %v434_v45 = vmul.f32 %v363_v43, %v363_v43  ;;  %v32_v43 = vld [vmem:[%s1561_s1] sm:$0xff] }
  0xd5   :  { %v438_v49 = vmul.f32 %v404_v44, %v404_v44  ;;  %v762_v2 = vpop.xlane.xlu0 %761  ;;  %v529_v44 = vsel %vm78_vm0, %v437_v34, 0.0 }
  0xd6   :  { %v520_v53 = vsel %vm78_vm0, %v434_v45, 0.0  ;;  %v854_v40 = vperm.slane %v762_v2, %v1350_v51 }
  0xd7   :  { %v532_v57 = vsel %vm78_vm0, %v438_v49, 0.0 }
  0xd8   :  { %515 = vadd.xlane.f32.xlu2 %v514_v41  ;;  %494 = vadd.xlane.f32.xlu1 %v493_v33  ;;  %v853_v41 = vsel %vm574_vm2, %v852_v26, %v851_v27 }
  0xd9   :  { %518 = vadd.xlane.f32.xlu0 %v517_v42  ;;  %v860_v42 = vsel %vm574_vm2, %v859_v28, %v858_v32  ;;  %v855_v45 = vsel %vm578_vm3, %v854_v40, %v853_v41 }
  0xda   :  { %v868_v49 = vsel %vm639_vm9, %v855_v45, %v867_v48 }
  0xdd   :  { %v774_v30 = vpop.xlane.xlu0 %773 }
  0xde   :  { %v861_v33 = vperm.slane %v774_v30, %v1350_v51 }
  0xe0   :  { %527 = vadd.xlane.f32.xlu2 %v526_v52  ;;  %521 = vadd.xlane.f32.xlu1 %v520_v53  ;;  %v862_v46 = vsel %vm578_vm3, %v861_v33, %v860_v42 }
  0xe1   :  { %533 = vadd.xlane.f32.xlu0 %v532_v57  ;;  %v869_v50 = vsel %vm641_vm10, %v862_v46, %v868_v49 }
  0xe2   :  { %v871_v52 = vsel %vm78_vm0, %v869_v50, 0.0 }
  0xe8   :  { %497 = vadd.xlane.f32.xlu2 %v496_v62 }
  0xf0   :  { %509 = vadd.xlane.f32.xlu2 %v508_v12 }
  0xf8   :  { %530 = vadd.xlane.f32.xlu2 %v529_v44 }
  0xf9   :  { %68 = vperm.xlu1 %1009, %v32_v43  }
 0x100   :  { %872 = vadd.xlane.f32.xlu2 %v871_v52 }
 0x10a   :  { %v441_v53 = vpop.xlane.xlu2 %440 }
 0x10b   :  { %v453_v54 = vpop.xlane.xlu1 %452  ;;  %v567_v7 = vperm.slane %v441_v53, %v1334_v36 }
 0x10c   :  { %v580_v59 = vperm.slane %v453_v54, %v1334_v36 }
 0x112   :  { %v444_v62 = vpop.xlane.xlu0 %443 }
 0x113   :  { %v465_v56 = vpop.xlane.xlu1 %464  ;;  %v456_v57 = vpop.xlane.xlu2 %455  ;;  %v569_v58 = vperm.slane %v444_v62, %v1337_v38 }
 0x114   :  { %v581_v60 = vperm.slane %v456_v57, %v1337_v38  ;;  %v587_v4 = vperm.slane %v465_v56, %v1334_v36 }
 0x115   :  { %v571_v16 = vsel %vm570_vm1, %v569_v58, %v567_v7 }
 0x116   :  { %v582_v61 = vsel %vm570_vm1, %v581_v60, %v580_v59 }
 0x11b   :  { %v468_v63 = vpop.xlane.xlu2 %467  ;;  %v477_v2 = vpop.xlane.xlu1 %476 }
 0x11c   :  { %v588_v0 = vperm.slane %v468_v63, %v1337_v38  ;;  %v459_v6 = vpop.xlane.xlu0 %458  ;;  %v594_v17 = vperm.slane %v477_v2, %v1334_v36 }
 0x11d   :  { %v583_v15 = vperm.slane %v459_v6, %v1346_v47 }
 0x11e   :  { %v589_v1 = vsel %vm570_vm1, %v588_v0, %v587_v4 }
 0x11f   :  { %v584_v28 = vsel %vm574_vm2, %v583_v15, %v582_v61 }
 0x123   :  { %v480_v5 = vpop.xlane.xlu2 %479  ;;  %v450_v9 = vpop.xlane.xlu1 %449 }
 0x124   :  { %v471_v13 = vpop.xlane.xlu0 %470  ;;  %v595_v3 = vperm.slane %v480_v5, %v1337_v38  ;;  %v577_v19 = vperm.slane %v450_v9, %v1350_v51 }
 0x125   :  { %v590_v18 = vperm.slane %v471_v13, %v1346_v47 }
 0x126   :  { %v596_v24 = vsel %vm570_vm1, %v595_v3, %v594_v17 }
 0x127   :  { %v591_v31 = vsel %vm574_vm2, %v590_v18, %v589_v1 }
 0x12b   :  { %v447_v10 = vpop.xlane.xlu2 %446  ;;  %v474_v55 = vpop.xlane.xlu1 %473 }
 0x12c   :  { %v573_v12 = vperm.slane %v447_v10, %v1346_v47  ;;  %v486_v14 = vpop.xlane.xlu0 %485  ;;  %v592_v21 = vperm.slane %v474_v55, %v1350_v51 }
 0x12d   :  { %v599_v26 = vperm.slane %v486_v14, %v1350_v51 }
 0x12e   :  { %v575_v20 = vsel %vm574_vm2, %v573_v12, %v571_v16  ;;  %v593_v35 = vsel %vm578_vm3, %v592_v21, %v591_v31  ;;  %v31_v16 = vld [vmem:[%s1560_s0] sm:$0xff] }
 0x12f   :  { %v579_v32 = vsel %vm578_vm3, %v577_v19, %v575_v20  ;;  %v1069_v20 = vmov 0.0  }
 0x133   :  { %v483_v11 = vpop.xlane.xlu2 %482  ;;  %v513_v22 = vpop.xlane.xlu1 %512 }
 0x134   :  { %v597_v8 = vperm.slane %v483_v11, %v1346_v47  ;;  %v489_v33 = vpop.xlane.xlu0 %488  ;;  %v615_v5 = vperm.slane %v513_v22, %v1334_v36 }
 0x135   :  { %v601_v54 = vperm.slane %v489_v33, %v1334_v36 }
 0x136   :  { %v598_v30 = vsel %vm574_vm2, %v597_v8, %v596_v24 }
 0x137   :  { %v600_v25 = vsel %vm578_vm3, %v599_v26, %v598_v30 }
 0x13b   :  { %v462_v23 = vpop.xlane.xlu2 %461  ;;  %v525_v43 = vpop.xlane.xlu1 %524 }
 0x13c   :  { %v585_v27 = vperm.slane %v462_v23, %v1350_v51  ;;  %v504_v39 = vpop.xlane.xlu0 %503  ;;  %v622_v7 = vperm.slane %v525_v43, %v1334_v36 }
 0x13d   :  { %v609_v52 = vperm.slane %v504_v39, %v1337_v38 }
 0x13e   :  { %v586_v34 = vsel %vm578_vm3, %v585_v27, %v584_v28 }
 0x13f   :  { %v630_v37 = vsel %vm629_vm4, %v586_v34, %v579_v32 }
 0x140   :  { %v632_v40 = vsel %vm631_vm5, %v593_v35, %v630_v37 }
 0x141   :  { %v634_v41 = vsel %vm633_vm6, %v600_v25, %v632_v40 }
 0x143   :  { %v501_v42 = vpop.xlane.xlu2 %500  ;;  %v492_v44 = vpop.xlane.xlu1 %491 }
 0x144   :  { %v507_v46 = vpop.xlane.xlu0 %506  ;;  %v608_v53 = vperm.slane %v501_v42, %v1334_v36  ;;  %v602_v56 = vperm.slane %v492_v44, %v1337_v38 }
 0x145   :  { %v611_v61 = vperm.slane %v507_v46, %v1346_v47 }
 0x146   :  { %v610_v63 = vsel %vm570_vm1, %v609_v52, %v608_v53  ;;  %v603_v0 = vsel %vm570_vm1, %v602_v56, %v601_v54 }
 0x147   :  { %v612_v6 = vsel %vm574_vm2, %v611_v61, %v610_v63 }
 0x14b   :  { %v516_v29 = vpop.xlane.xlu2 %515  ;;  %v495_v48 = vpop.xlane.xlu1 %494 }
 0x14c   :  { %v519_v50 = vpop.xlane.xlu0 %518  ;;  %v604_v57 = vperm.slane %v495_v48, %v1346_v47  ;;  %v616_v2 = vperm.slane %v516_v29, %v1337_v38 }
 0x14d   :  { %v618_v13 = vperm.slane %v519_v50, %v1346_v47 }
 0x14e   :  { %v605_v1 = vsel %vm574_vm2, %v604_v57, %v603_v0  ;;  %v617_v58 = vsel %vm570_vm1, %v616_v2, %v615_v5 }
 0x14f   :  { %v619_v18 = vsel %vm574_vm2, %v618_v13, %v617_v58 }
 0x153   :  { %v528_v45 = vpop.xlane.xlu2 %527  ;;  %v522_v59 = vpop.xlane.xlu1 %521 }
 0x154   :  { %v534_v10 = vpop.xlane.xlu0 %533  ;;  %v623_v55 = vperm.slane %v528_v45, %v1337_v38  ;;  %v620_v12 = vperm.slane %v522_v59, %v1350_v51 }
 0x155   :  { %v627_v15 = vperm.slane %v534_v10, %v1350_v51 }
 0x156   :  { %v624_v19 = vsel %vm570_vm1, %v623_v55, %v622_v7 }
 0x15b   :  { %v498_v49 = vpop.xlane.xlu2 %497 }
 0x15c   :  { %v606_v62 = vperm.slane %v498_v49, %v1350_v51 }
 0x15e   :  { %v607_v9 = vsel %vm578_vm3, %v606_v62, %v605_v1 }
 0x15f   :  { %v636_v3 = vsel %vm635_vm7, %v607_v9, %v634_v41 }
 0x163   :  { %v510_v60 = vpop.xlane.xlu2 %509 }
 0x164   :  { %v613_v4 = vperm.slane %v510_v60, %v1350_v51  ;;  %v621_v51 = vsel %vm578_vm3, %v620_v12, %v619_v18 }
 0x166   :  { %v614_v11 = vsel %vm578_vm3, %v613_v4, %v612_v6 }
 0x167   :  { %v638_v17 = vsel %vm637_vm8, %v614_v11, %v636_v3 }
 0x16b   :  { %v531_v14 = vpop.xlane.xlu2 %530  ;;  %v69_v8 = vpop.permute.xlu1 %68 }
 0x16c   :  { %v625_v38 = vperm.slane %v531_v14, %v1346_v47  ;;  %vm70_vm11 = vcmp.eq.s32.totalorder %v1334_v36, %v69_v8  ;;  %v640_v47 = vsel %vm639_vm9, %v621_v51, %v638_v17 }
 0x16d   :  { %v934_v21 = vsel %vm70_vm11, 1.0, %v1069_v20 }
 0x16e   :  { %v626_v22 = vsel %vm574_vm2, %v625_v38, %v624_v19  ;;  %v73_v23 = vmul.f32 %v934_v21, %v31_v16 }
 0x16f   :  { %v628_v24 = vsel %vm578_vm3, %v627_v15, %v626_v22 }
 0x170   :  { %v642_v26 = vsel %vm641_vm10, %v628_v24, %v640_v47  ;;  %v75_v27 = vsel %vm74_vm12, %v73_v23, 0.0 }
 0x171   :  { %v644_v36 = vsel %vm78_vm0, %v642_v26, 0.0  ;;  %76 = vadd.xlane.f32.xlu2 %v75_v27 }
 0x172   :  { %645 = vadd.xlane.f32.xlu0 %v644_v36 }
 0x173   :  { %v873_v28 = vpop.xlane.xlu2 %872 }
 0x174   :  { %v874_v30 = vmul.f32 2.0, %v873_v28 }
 0x1e4   :  { %v77_v31 = vpop.xlane.xlu2 %76 }
 0x1e5   :  { %v646_v32 = vpop.xlane.xlu0 %645  ;;  %v891_v34 = vsel %vm890_vm13, %v77_v31, 0.0 }
 0x1e6   :  { %v875_v35 = vsub.f32 %v646_v32, %v874_v30  ;;  %892 = vadd.xlane.f32.xlu0 %v891_v34 }
 0x1e8   :  { %v876_v37 = vadd.f32 32.0, %v875_v35 }
 0x1ea   :  { %v877_v25 = vmax.f32 %v876_v37, 0.0 }
 0x1ec   :  { %1011 = vrsqrt.f32 %v877_v25  ;;  %vm885_vm14 = vcmp.eq.f32.partialorder %v877_v25, inf  ;;  %v888_v44 = vand.u32 2147483648, %v877_v25  ;;  %vm887_vm15 = vcmp.eq.f32.partialorder %v877_v25, 0.0 }
 0x1f2   :  { %v1012_v40 = vpop.eup %1011 }
 0x1f3   :  { %v879_v41 = vmul.f32 %v1012_v40, %v877_v25 }
 0x1f5   :  { %v880_v33 = vmul.f32 %v1012_v40, %v879_v41 }
 0x1f7   :  { %v881_v42 = vmul.f32 0.5, %v880_v33 }
 0x1f9   :  { %v882_v43 = vsub.f32 1.5, %v881_v42 }
 0x1fb   :  { %v883_v29 = vmul.f32 %v1012_v40, %v882_v43 }
 0x1fd   :  { %v884_v39 = vmul.f32 %v883_v29, %v877_v25 }
 0x1ff   :  { %v886_v45 = vsel %vm885_vm14, %v877_v25, %v884_v39 }
 0x200   :  { %v889_v46 = vsel %vm887_vm15, %v888_v44, %v886_v45 }
 0x201   :  { %v903_v48 = vsel %vm890_vm13, %v889_v46, 0.0 }
 0x202   :  { %904 = vadd.xlane.f32.xlu2 %v903_v48 }
 0x259   :  { %v893_v49 = vpop.xlane.xlu0 %892 }
 0x25a   :  { %v894_v50 = vrot.slane %v893_v49, 4 }
 0x25c   :  { %v895_v52 = vadd.f32 %v894_v50, %v893_v49 }
 0x25e   :  { %v896_v53 = vrot.slane %v895_v52, 2 }
 0x260   :  { %v897_v54 = vadd.f32 %v896_v53, %v895_v52 }
 0x262   :  { %v898_v56 = vrot.slane %v897_v54, 1 }
 0x264   :  { %v899_v57 = vadd.f32 %v898_v56, %v897_v54 }
 0x266   :  { %999 = vpush %v899_v57 }
 0x275   :  { %v905_v59 = vpop.xlane.xlu2 %904 }
 0x276   :  { %v906_v60 = vrot.slane %v905_v59, 4 }
 0x278   :  { %v907_v61 = vadd.f32 %v906_v60, %v905_v59 }
 0x27a   :  { %v908_v62 = vrot.slane %v907_v61, 2 }
 0x27c   :  { %v909_v63 = vadd.f32 %v908_v62, %v907_v61 }
 0x27e   :  { %v910_v4 = vrot.slane %v909_v63, 1 }
 0x280   :  { %v911_v0 = vadd.f32 %v910_v4, %v909_v63 }
 0x282   :  { %1001 = vpush %v911_v0 }
 0x297   :  { %s1000_s0 = spop %999 }
 0x298   :  { %s901_s21 = ssub.f32 0.0, %s1000_s0 }
 0x29a   :  { %s902_s24 = smul.f32 0.125, %s901_s21 }
 0x2b3   :  { %s1002_s25 = spop %1001 }
 0x2b4   :  { %s913_s26 = smul.f32 0.000125, %s1002_s25 }
 0x2b6   :  { %s914_s30 = sadd.f32 %s913_s26, %s902_s24 }
 0x2b8   :  { %v915_v2 = vstv %s914_s30 }
 0x2b9   :  { %916 = vst [vmem:[#allocation5] sm:$0xff] %v915_v2 }
 0x2ba   :  { %927 = dma.vmem_to_hbm [thread:$0]  %s923_s23, 128, %s925_s29, [#allocation4]  }
 0x2bb   :  { %1063 = dma.done.wait [#allocation4], 128  }
 0x2bc   :  { %1064 = vsyncadd [#allocation4], 4294967168 }
 0x2bd   :  { %932 = vsyncpa [#allocation3], 1 }
 0x2be   :  { %933 = vsyncpa [#allocation4], 1 }

</bundles_post_ra>
